<compile_context>
chip_gen: v7x
topology: tpu7x:2x2x1
jax: 0.10.0
libtpu: 0.0.40
codegen_flags: <defaults>
</compile_context>

<pallas_src>
import jax
import jax.numpy as jnp
from jax import lax
from jax.experimental import pallas as pl
from jax.experimental.pallas import tpu as pltpu

EPS = 1e-5        # nn.BatchNorm1d default eps (lambda_batchnorm1d())
LANES = 128


def _round_up(x, m):
    return (x + m - 1) // m * m


def _make_gemm_stats_kernel(TL, Lout):
    """Pass 1: bf16 GEMM (MXU, f32 accumulate) + mean-shifted BN partials."""

    def kernel(p_ref, w_ref, stats_ref):
        # p_ref : (KC, TL) bf16   im2col patches tile (channels-major)
        # w_ref : (Cp, KC) bf16   GEMM weight (Cout zero-padded to Cp)
        # stats_ref : (Cp, 2) f32 col 0 = sum over valid positions, col 1 = M2
        y = jnp.dot(w_ref[...], p_ref[...],
                    preferred_element_type=jnp.float32)          # (Cp, TL) f32
        l = pl.program_id(1)
        nvalid = jnp.minimum(TL, Lout - l * TL)                   # >= 1
        col = lax.broadcasted_iota(jnp.int32, y.shape, 1)
        mask = col < nvalid                                       # valid Lout positions
        ym = jnp.where(mask, y, 0.0)
        s = jnp.sum(ym, axis=1, keepdims=True)                    # (Cp, 1)
        mu = s / nvalid.astype(jnp.float32)
        diff = jnp.where(mask, y - mu, 0.0)
        q = jnp.sum(diff * diff, axis=1, keepdims=True)           # (Cp, 1)
        stats_ref[:, 0:1] = s
        stats_ref[:, 1:2] = q

    return kernel


def _gemm_bn_relu_kernel(p_ref, w_ref, scale_ref, shift_ref, o_ref):
    """Pass 2: recompute GEMM, fused BatchNorm affine + ReLU, NCL-layout store."""
    y = jnp.dot(w_ref[...], p_ref[...],
                preferred_element_type=jnp.float32)               # (Cp, TL) f32
    y = jnp.maximum(y * scale_ref[...] + shift_ref[...], 0.0)
    o_ref[...] = y[: o_ref.shape[0], :].astype(o_ref.dtype)       # drop padded channels


def conv_block1d_pallas(x, weight, gamma, beta, *, stride, padding, dilation=1,
                        groups=1, max_tile_l=None,
                        vmem_budget_bytes=28 * 1024 * 1024):
    """ConvBlock1d forward.

    x      : (N, Cin, L)       f32
    weight : (Cout, Cin, K)    PyTorch nn.Conv1d weight layout, bias=False
    gamma  : (Cout,)           BatchNorm1d weight
    beta   : (Cout,)           BatchNorm1d bias
    Returns (N, Cout, Lout) f32 with training-mode (batch-stats) BN + ReLU.
    """
    assert groups == 1  # TODO(synk): grouped convolution (groups > 1) not implemented.
    N, Cin, L = x.shape
    Cout, Cin_w, K = weight.shape
    assert Cin_w == Cin
    s, p, d = int(stride), int(padding), int(dilation)

    Lout = (L + 2 * p - d * (K - 1) - 1) // s + 1
    KC = K * Cin
    # Lane-dense channel padding; use 256-multiples for wide Cout (v6e/v7x MXU).
    Cp = _round_up(Cout, 256) if Cout > LANES else LANES

    # ---- tile size along Lout from a VMEM footprint budget ----
    # per-step bytes ~ 2*(KC*TL*2) [patches dbuf] + 2*(Cp*KC*2) [w dbuf]
    #                + 2*(Cout*TL*4) [out dbuf]  + ~2*(Cp*TL*4) [f32 GEMM temps]
    denom = 4 * KC + 8 * Cout + 8 * Cp
    tl_cap = max((vmem_budget_bytes - 4 * Cp * KC) // denom, LANES)
    if max_tile_l is not None:
        tl_cap = min(tl_cap, int(max_tile_l))
    if Lout <= tl_cap:
        TL, n_l = Lout, 1          # single tile: full-dim blocks (any alignment OK)
    else:
        TL = max((tl_cap // LANES) * LANES, LANES)   # lane-dense multi-tile
        n_l = pl.cdiv(Lout, TL)
    Lout_pad = TL * n_l

    # ---- host glue: bf16 im2col in channels-major (N, K*Cin, Lout_pad), one pad ----
    needed = (K - 1) * d + s * (Lout_pad - 1) + 1
    pad_right = max(p, needed - (L + p))
    x_pad = jnp.pad(x.astype(jnp.bfloat16), ((0, 0), (0, 0), (p, pad_right)))
    taps = [x_pad[:, :, k * d:k * d + s * (Lout_pad - 1) + 1:s] for k in range(K)]
    patches = jnp.stack(taps, axis=1).reshape(N, KC, Lout_pad)        # bf16

    w_t = weight.transpose(0, 2, 1).reshape(Cout, KC).astype(jnp.bfloat16)
    w_t = jnp.pad(w_t, ((0, Cp - Cout), (0, 0)))                      # (Cp, KC) bf16

    gpad = jnp.pad(gamma.astype(jnp.float32), (0, Cp - Cout))
    bpad = jnp.pad(beta.astype(jnp.float32), (0, Cp - Cout))

    cparams = pltpu.CompilerParams(
        dimension_semantics=("parallel", "parallel"),
        vmem_limit_bytes=48 * 1024 * 1024)   # <= v7x 64 MiB physical; ample on v5e/v6e

    gemm_flops = 2 * N * Cp * KC * Lout_pad
    patch_bytes = N * KC * Lout_pad * 2
    w_bytes = Cp * KC * 2

    # ---- pass 1: GEMM + per-tile mean-shifted BN partial statistics ----
    stats = pl.pallas_call(
        _make_gemm_stats_kernel(TL, Lout),
        out_shape=jax.ShapeDtypeStruct((N, n_l, Cp, 2), jnp.float32),
        grid=(N, n_l),
        in_specs=[pl.BlockSpec((None, KC, TL), lambda n, l: (n, 0, l)),
                  pl.BlockSpec((Cp, KC), lambda n, l: (0, 0))],
        out_specs=pl.BlockSpec((None, None, Cp, 2), lambda n, l: (n, l, 0, 0)),
        compiler_params=cparams,
        cost_estimate=pl.CostEstimate(
            flops=gemm_flops, transcendentals=0,
            bytes_accessed=patch_bytes + w_bytes + N * n_l * Cp * 2 * 4),
    )(patches, w_t)

    # ---- tiny O(C) host fold: Chan-style combine (no E[x^2]-E[x]^2 cancellation) ----
    Mf = float(N * Lout)
    counts = jnp.minimum(TL, Lout - TL * jnp.arange(n_l)).astype(jnp.float32)  # (n_l,)
    sums = stats[..., 0]                                   # (N, n_l, Cp)
    m2s = stats[..., 1]                                    # (N, n_l, Cp)
    mean = jnp.sum(sums, axis=(0, 1)) / Mf                 # (Cp,)
    tile_mean = sums / counts[None, :, None]
    between = jnp.sum(counts[None, :, None] * (tile_mean - mean[None, None, :]) ** 2,
                      axis=(0, 1))
    var = jnp.maximum((jnp.sum(m2s, axis=(0, 1)) + between) / Mf, 0.0)  # biased (training BN)
    inv = gpad * lax.rsqrt(var + EPS)
    scale = inv.reshape(Cp, 1)
    shift = (bpad - mean * inv).reshape(Cp, 1)
    # TODO(synk): BatchNorm1d running-stats (momentum) buffer updates are not modeled.

    # ---- pass 2: recompute GEMM + fused BN affine + ReLU, direct NCL output ----
    out = pl.pallas_call(
        _gemm_bn_relu_kernel,
        out_shape=jax.ShapeDtypeStruct((N, Cout, Lout_pad), jnp.float32),
        grid=(N, n_l),
        in_specs=[pl.BlockSpec((None, KC, TL), lambda n, l: (n, 0, l)),
                  pl.BlockSpec((Cp, KC), lambda n, l: (0, 0)),
                  pl.BlockSpec((Cp, 1), lambda n, l: (0, 0)),
                  pl.BlockSpec((Cp, 1), lambda n, l: (0, 0))],
        out_specs=pl.BlockSpec((None, Cout, TL), lambda n, l: (n, 0, l)),
        compiler_params=cparams,
        cost_estimate=pl.CostEstimate(
            flops=gemm_flops + 3 * N * Cp * Lout_pad, transcendentals=0,
            bytes_accessed=patch_bytes + w_bytes + 2 * Cp * 4
            + N * Cout * Lout_pad * 4),
    )(patches, w_t, scale, shift)

    return out if Lout_pad == Lout else out[:, :, :Lout]


def conv_block1d_ref(x, weight, gamma, beta, *, stride, padding, dilation=1):
    """Pure-JAX reference (bf16 conv inputs + f32 accumulate, like the kernel)."""
    y = lax.conv_general_dilated(
        x.astype(jnp.bfloat16), weight.astype(jnp.bfloat16),
        window_strides=(stride,), padding=[(padding, padding)],
        rhs_dilation=(dilation,), dimension_numbers=("NCH", "OIH", "NCH"),
        preferred_element_type=jnp.float32)
    mean = jnp.mean(y, axis=(0, 2), keepdims=True)
    var = jnp.mean((y - mean) ** 2, axis=(0, 2), keepdims=True)
    y = (y - mean) * lax.rsqrt(var + EPS)
    y = y * gamma.reshape(1, -1, 1) + beta.reshape(1, -1, 1)
    return jnp.maximum(y, 0.0)


if __name__ == "__main__":
    key = jax.random.PRNGKey(0)
    kx, kw = jax.random.split(key)

    # Small ConvBlock1d-typical config; L chosen so Lout=144 exercises two
    # Lout-tiles (one partial) with max_tile_l=128, plus the N grid axis.
    N, Cin, L = 2, 4, 288
    Cout, K = 8, 3
    stride, padding, dilation = 2, 1, 1

    x = jax.random.normal(kx, (N, Cin, L), jnp.float32)
    weight = 0.1 * jax.random.normal(kw, (Cout, Cin, K), jnp.float32)  # Conv1d weight
    gamma = 1.0 + 0.1 * jnp.arange(Cout, dtype=jnp.float32)            # BN weight
    beta = 0.05 * jnp.arange(Cout, dtype=jnp.float32)                  # BN bias

    y = conv_block1d_pallas(x, weight, gamma, beta, stride=stride,
                            padding=padding, dilation=dilation, max_tile_l=128)
    y = jax.block_until_ready(y)

    Lout = (L + 2 * padding - dilation * (K - 1) - 1) // stride + 1
    assert y.shape == (N, Cout, Lout), y.shape

    y_ref = conv_block1d_ref(x, weight, gamma, beta, stride=stride,
                             padding=padding, dilation=dilation)
    max_err = float(jnp.max(jnp.abs(y - y_ref)))
    assert jnp.allclose(y, y_ref, atol=1e-3, rtol=1e-3), max_err

    print("KERNEL_OK")
</pallas_src>

<mosaic_0001>
module attributes {stable_mosaic.version = 11 : i64} {
  func.func @kernel(%arg0: i32, %arg1: i32, %arg2: memref<1x12x128xbf16, #tpu.memory_space<vmem>>, %arg3: memref<128x12xbf16, #tpu.memory_space<vmem>>, %arg4: memref<1x1x128x2xf32, #tpu.memory_space<vmem>>) attributes {dimension_semantics = [#tpu.dimension_semantics<parallel>, #tpu.dimension_semantics<parallel>], iteration_bounds = array<i64: 2, 2>, scalar_prefetch = 0 : i64, scratch_operands = 0 : i64, tpu.core_type = #tpu.core_type<tc>, window_params = [{transform_indices = @transform_0, window_bounds = array<i64: 1, 12, 128>}, {pipeline_mode = #tpu.pipeline_mode<synchronous>, transform_indices = @transform_1, window_bounds = array<i64: 128, 12>}, {transform_indices = @transform_2, window_bounds = array<i64: 1, 1, 128, 2>}]} {
    %c0 = arith.constant 0 : index
    %c0_0 = arith.constant 0 : index
    %0 = vector.load %arg3[%c0, %c0_0] : memref<128x12xbf16, #tpu.memory_space<vmem>>, vector<128x12xbf16>
    %c0_1 = arith.constant 0 : index
    %c0_2 = arith.constant 0 : index
    %c0_3 = arith.constant 0 : index
    %1 = vector.load %arg2[%c0_1, %c0_2, %c0_3] : memref<1x12x128xbf16, #tpu.memory_space<vmem>>, vector<1x12x128xbf16>
    %2 = vector.shape_cast %1 : vector<1x12x128xbf16> to vector<12x128xbf16>
    %cst = arith.constant dense<0.000000e+00> : vector<128x128xf32>
    %3 = tpu.matmul %0, %2, %cst {dimension_numbers = #tpu.dot_dimension_numbers<[1], [0], [0], [1], [0, 0, 1, 1], [], []>} : vector<128x12xbf16>, vector<12x128xbf16>, vector<128x128xf32> -> vector<128x128xf32>
    %c128_i32 = arith.constant 128 : i32
    %4 = arith.muli %arg1, %c128_i32 : i32
    %c144_i32 = arith.constant 144 : i32
    %5 = arith.subi %c144_i32, %4 : i32
    %c128_i32_4 = arith.constant 128 : i32
    %6 = arith.minsi %c128_i32_4, %5 : i32
    %7 = tpu.iota {dimensions = array<i32: 1>} : vector<128x128xi32>
    %8 = vector.broadcast %6 : i32 to vector<128x128xi32>
    %9 = arith.cmpi slt, %7, %8 : vector<128x128xi32>
    %cst_5 = arith.constant 0.000000e+00 : f32
    %10 = vector.broadcast %cst_5 : f32 to vector<128x128xf32>
    %11 = arith.select %9, %3, %10 : vector<128x128xi1>, vector<128x128xf32>
    %cst_6 = arith.constant dense<0.000000e+00> : vector<128xf32>
    %12 = vector.multi_reduction <add>, %11, %cst_6 [1] : vector<128x128xf32> to vector<128xf32>
    %13 = vector.shape_cast %12 : vector<128xf32> to vector<128x1xf32>
    %14 = arith.sitofp %6 : i32 to f32
    %15 = vector.broadcast %14 : f32 to vector<128x1xf32>
    %16 = arith.divf %13, %15 : vector<128x1xf32>
    %17 = vector.broadcast %16 : vector<128x1xf32> to vector<128x128xf32>
    %18 = arith.subf %3, %17 : vector<128x128xf32>
    %cst_7 = arith.constant 0.000000e+00 : f32
    %19 = vector.broadcast %cst_7 : f32 to vector<128x128xf32>
    %20 = arith.select %9, %18, %19 : vector<128x128xi1>, vector<128x128xf32>
    %21 = arith.mulf %20, %20 : vector<128x128xf32>
    %cst_8 = arith.constant dense<0.000000e+00> : vector<128xf32>
    %22 = vector.multi_reduction <add>, %21, %cst_8 [1] : vector<128x128xf32> to vector<128xf32>
    %23 = vector.shape_cast %22 : vector<128xf32> to vector<128x1xf32>
    %c0_9 = arith.constant 0 : index
    %c0_10 = arith.constant 0 : index
    %c0_11 = arith.constant 0 : index
    %c0_12 = arith.constant 0 : index
    %24 = vector.load %arg4[%c0_9, %c0_10, %c0_11, %c0_12] : memref<1x1x128x2xf32, #tpu.memory_space<vmem>>, vector<1x1x128x1xf32>
    %25 = vector.shape_cast %24 : vector<1x1x128x1xf32> to vector<128x1xf32>
    %26 = vector.shape_cast %13 : vector<128x1xf32> to vector<1x1x128x1xf32>
    tpu.vector_store %arg4[%c0_9, %c0_10, %c0_11, %c0_12], %26 {strides = array<i32>} : memref<1x1x128x2xf32, #tpu.memory_space<vmem>>, vector<1x1x128x1xf32>,
    %c0_13 = arith.constant 0 : index
    %c0_14 = arith.constant 0 : index
    %c0_15 = arith.constant 0 : index
    %c1 = arith.constant 1 : index
    %27 = vector.load %arg4[%c0_13, %c0_14, %c0_15, %c1] : memref<1x1x128x2xf32, #tpu.memory_space<vmem>>, vector<1x1x128x1xf32>
    %28 = vector.shape_cast %27 : vector<1x1x128x1xf32> to vector<128x1xf32>
    %29 = vector.shape_cast %23 : vector<128x1xf32> to vector<1x1x128x1xf32>
    tpu.vector_store %arg4[%c0_13, %c0_14, %c0_15, %c1], %29 {strides = array<i32>} : memref<1x1x128x2xf32, #tpu.memory_space<vmem>>, vector<1x1x128x1xf32>,
    return
  }
  func.func @transform_0(%arg0: i32, %arg1: i32) -> (i32, i32, i32) {
    %c0_i32 = arith.constant 0 : i32
    %c0_i32_0 = arith.constant 0 : i32
    return %arg0, %c0_i32, %arg1 : i32, i32, i32
  }
  func.func @transform_1(%arg0: i32, %arg1: i32) -> (i32, i32) {
    %c0_i32 = arith.constant 0 : i32
    %c0_i32_0 = arith.constant 0 : i32
    %c0_i32_1 = arith.constant 0 : i32
    return %c0_i32, %c0_i32_0 : i32, i32
  }
  func.func @transform_2(%arg0: i32, %arg1: i32) -> (i32, i32, i32, i32) {
    %c0_i32 = arith.constant 0 : i32
    %c0_i32_0 = arith.constant 0 : i32
    %c0_i32_1 = arith.constant 0 : i32
    return %arg0, %arg1, %c0_i32, %c0_i32_0 : i32, i32, i32, i32
  }
}

</mosaic_0001>

<bundles_post_ra>
// kernel: tpu_custom_call.1
= control target key start
LH: loop header
LB: loop body
LE: loop exit
PB: predicated region body
PF: predicated region fallthrough
CT: control target
= control target key end

     0   :  { %s889_s9 = smov 0   ;;  %s891_s10 = smov 0   ;;  %s1233_s0 = inlined_call_operand.vmem [shape: bf16[2,12,256], index: 0, kind: input, shape index: {}]   ;;  %s1234_s1 = inlined_call_operand.vmem [shape: bf16[128,12], index: 1, kind: input, shape index: {}]   ;;  %s1235_s2 = inlined_call_operand.vmem [shape: f32[2,2,128,2], index: 2, kind: output, shape index: {}]  }
   0x1   :  { %s893_s11 = smov 0   ;;  %s895_s12 = smov 0  }
   0x2   :  { %s897_s13 = smov 0   ;;  %s899_s14 = smov 0  }
   0x3   :  { %s901_s15 = smov 0  }
   0x4 LB: > { %s21_s16 = sadd.s32 1, %s864_s13  ;;  %s24_s17 = sadd.s32 1, %s868_s14  ;;  %s872_s15 = sphi %s901_s15, %s12_s15   ;;  %s868_s14 = sphi %s899_s14, %s1243_s14   ;;  %s864_s13 = sphi %s897_s13, %s1242_s13   ;;  %s860_s12 = sphi %s895_s12, %s1241_s12   ;;  %s856_s11 = sphi %s893_s11, %s1240_s11   ;;  %s852_s10 = sphi %s891_s10, %s1239_s10   ;;  %s848_s9 = sphi %s889_s9, %s1238_s9  }
   0x5   : > { %p22_p0 = scmp.ge.s32.totalorder %s21_s16, 2  ;;  %p40_p1 = scmp.ne.s32.totalorder %s852_s10, %s848_s9 }
   0x6   : > { %p41_p2 = scmp.eq.s32.totalorder %s872_s15, 0  ;;  %s33_s21 = sadd.s32 1, %s852_s10 }
   0x7   : > { %s1245_s16 = smov (%p22_p0, %s21_s16), 0  ;;  %s1247_s17 = smov (!%p22_p0, %s24_s17), %s868_s14 }
   0x8   : > { %p42_p3 = por %p41_p2, %p40_p1  ;;  %p26_p4 = scmp.ge.s32.totalorder %s1247_s17, 2 }
   0x9   : > { %s29_s18 = ssub.s32 %s864_s13, %s1245_s16  ;;  %p691_p6 = scmp.ge.s32.totalorder %s872_s15, 4 }
   0xa   : > { %s1249_s17 = smov (%p26_p4, %s1247_s17), 0 }
   0xb   : > { %s28_s19 = ssub.s32 %s868_s14, %s1249_s17  ;;  %118 = sbr.rel (%p691_p6) target bundleno = 25 (0x19), region = 20 }
   0xc   : > { %s30_s20 = sor.u32 %s29_s18, %s28_s19 }
   0xd   : > { %p31_p5 = scmp.eq.s32.totalorder %s30_s20, 0 }
   0xf   : > { %s940_s22 = scalar_select %p31_p5, %s852_s10, %s33_s21  }
  0x12   : > { %121 = sbr.rel (!%p42_p3) target bundleno = 25 (0x19), region = 24  ;;  %s123_s23 = sand.u32 (%p42_p3), 1, %s852_s10  }
  0x13   : > { %s693_s24 = sshll.u32 (%p42_p3), %s868_s14, 2  ;;  %s692_s25 = sshll.u32 (%p42_p3), %s123_s23, 3 }
  0x14   : > { %s127_s26 = sadd.s32 (%p42_p3), %s864_s13, %s693_s24  ;;  %s125_s3 = scalar_lea.vmem (%p42_p3), [#allocation2], %s692_s25 }
  0x15   : > { %s694_s27 = sshll.u32 (%p42_p3), %s127_s26, 2 }
  0x16   : > { %s129_s30 = scalar_lea.vmem (%p42_p3), %s1233_s0, %s694_s27 }
  0x17   : > { %v145_v0 = vld [vmem:[%s129_s30] sm:$0xf] (%p42_p3)  ;;  %v147_v1 = vld [vmem:[%s129_s30 + $0x8] sm:$0xf] (%p42_p3) }
  0x18   : > { %146 = vst [vmem:[%s125_s3] sm:$0xf] (%p42_p3), %v145_v0  ;;  %148 = vst [vmem:[%s125_s3 + $0x4] sm:$0xf] (%p42_p3), %v147_v1 }
  0x19 PF: > { %p695_p7 = scmp.ge.s32.totalorder %s872_s15, 1  ;;  %p174_p8 = scmp.lt.s32.totalorder %s872_s15, 5 }
  0x1b   : > { %p175_p9 = pnand %p695_p7, %p174_p8 }
  0x1c   : > { %s181_s4 = sand.u32 (!%p175_p9), 1, %s848_s9   ;;  %v808_v2 = vld [vmem:[%s1234_s1] sm:$0xff] (!%p175_p9)   ;;  %vm279_vm0 = vcmask (!%p175_p9), 97280   ;;  %vm304_vm1 = vcmask (!%p175_p9), 1045504   ;;  %v810_v5 = vld [vmem:[%s1234_s1 + $0x8] sm:$0xff] (!%p175_p9)   ;;  %v812_v8 = vld [vmem:[%s1234_s1 + $0x10] sm:$0xff] (!%p175_p9)   ;;  %v409_v12 = vlaneseq (!%p175_p9) }
  0x1d   : > { %178 = sbr.rel (%p175_p9) target bundleno = 573 (0x23d), region = 65  ;;  %s696_s5 = sshll.u32 (!%p175_p9), %s181_s4, 3  ;;  %v809_v3 = vld [vmem:[%s1234_s1 + $0x20] sm:$0xff] (!%p175_p9)   ;;  %731 = vmatprep.mubr.msk.bf16.mxu0 (!%p175_p9), %vm279_vm0, %v808_v2  ;;  %v811_v7 = vld [vmem:[%s1234_s1 + $0x28] sm:$0xff] (!%p175_p9)   ;;  %v814_v9 = vld [vmem:[%s1234_s1 + $0x30] sm:$0xff] (!%p175_p9)   ;;  %vm560_vm3 = vcmask (!%p175_p9), 7168  }
  0x1e   : > { %s183_s19 = scalar_lea.vmem (!%p175_p9), [#allocation2], %s696_s5  ;;  %739 = vmatprep.mubr.msk.bf16.mxu1 (!%p175_p9), %vm279_vm0, %v809_v3  ;;  %v813_v10 = vld [vmem:[%s1234_s1 + $0x18] sm:$0xff] (!%p175_p9)   ;;  %s717_s4 = sshll.u32 (!%p175_p9), %s856_s11, 7  ;;  %v410_v13 = vand.u32 (!%p175_p9), 127, %v409_v12  ;;  %vm577_vm4 = vcmask (!%p175_p9), 15368  }
  0x1f   : > { %v807_v4 = vld [vmem:[%s183_s19] sm:$0x3f] (!%p175_p9)   ;;  %v815_v11 = vld [vmem:[%s1234_s1 + $0x38] sm:$0xff] (!%p175_p9)   ;;  %s406_s5 = ssub.s32 (!%p175_p9), 144, %s717_s4  ;;  %p206_p11 = scmp.lt.s32.totalorder (!%p175_p9), %s860_s12, 1 }
  0x20   : > { %749 = vmatprep.subr.msk.bf16.mxu0 (!%p175_p9), %vm304_vm1, %v807_v4  ;;  %750 = vmatprep.subr.msk.bf16.mxu1 (!%p175_p9), %vm304_vm1, %v807_v4  ;;  %v306_v6 = vsel (!%p175_p9), %vm304_vm1, %v807_v4, 0  ;;  %p407_p10 = scmp.lt.s32.totalorder (!%p175_p9), %s406_s5, 128  ;;  %p208_p12 = scmp.lt.s32.totalorder (!%p175_p9), %s856_s11, 1 }
  0x21   : > { %730 = vmatpush3.bf16.msra.mxu0 (!%p175_p9), %v306_v6  ;;  %748 = vmatpush3.bf16.msra.mxu1 (!%p175_p9), %v306_v6 }
  0x24   : > { %732 = vmatmul.mubr.msk.bf16.vlgmr.msra.gmra.mrb[0].mxu0 %vm279_vm0, %v810_v5  ;;  %740 = vmatmul.mubr.msk.bf16.vlgmr.msra.gmra.mrb[0].mxu1 %vm279_vm0, %v811_v7  ;;  %s1251_s5 = smov (!%p407_p10, %s406_s5), 128  ;;  %s1253_s12 = smov (!%p206_p11, %s860_s12), 1 }
  0x25   : > { %735 = vmatprep.mubr.msk.bf16.mxu0 %vm279_vm0, %v812_v8  ;;  %743 = vmatprep.mubr.msk.bf16.mxu1 %vm279_vm0, %v814_v9  ;;  %v411_v14 = vstv %s1251_s5  ;;  %s461_s6 = scvt.s32.f32 %s1251_s5  ;;  %s1255_s11 = smov (!%p208_p12, %s856_s11), 1 }
  0x26   : > { %vm988_vm2 = vcmp.lt.s32.totalorder %v410_v13, %v411_v14  ;;  %s697_s7 = sshll.u32 %s1255_s11, 4  ;;  %s698_s8 = sshll.u32 %s1253_s12, 5 }
  0x27   : > { %v462_v48 = vstv %s461_s6  ;;  %s212_s18 = sadd.s32 %s698_s8, %s697_s7 }
  0x28   : > { %816 = vrcp.f32 %v462_v48  ;;  %s699_s19 = sshll.u32 %s212_s18, 3 }
  0x29   : > { %s1082_s9 = scalar_lea.vmem %s1235_s2, %s699_s19 }
  0x2c   : > { %736 = vmatmul.mubr.msk.bf16.gmra.mrb[4].mxu0 %vm279_vm0, %v813_v10  ;;  %744 = vmatmul.mubr.msk.bf16.gmra.mrb[4].mxu1 %vm279_vm0, %v815_v11 }
  0x32   : > { %v1077_v49 = vpop.eup %816 }
  0xf7   : > { %v992_v16 = vpop.f32.mrb[0].mxu0  ;;  %v994_v17 = vpop.f32.mrb[0].mxu1 }
  0xf8   : > { %v996_v18 = vpop.f32.mrb[1].mxu0  ;;  %v998_v19 = vpop.f32.mrb[1].mxu1  ;;  %v423_v20 = vsel %vm988_vm2, %v994_v17, 0.0  ;;  %v415_v21 = vsel %vm988_vm2, %v992_v16, 0.0 }
  0xf9   : > { %449 = vadd.xlane.f32.xlu0 %v423_v20  ;;  %v1006_v22 = vpop.f32.mrb[2].mxu1  ;;  %433 = vadd.xlane.f32.xlu1 %v415_v21  ;;  %v1008_v23 = vpop.f32.mrb[2].mxu0  ;;  %v413_v26 = vsel %vm988_vm2, %v996_v18, 0.0  ;;  %v421_v30 = vsel %vm988_vm2, %v998_v19, 0.0 }
  0xfa   : > { %v1010_v24 = vpop.f32.mrb[3].mxu0  ;;  %v1012_v25 = vpop.f32.mrb[3].mxu1  ;;  %v416_v27 = vsel %vm988_vm2, %v1008_v23, 0.0  ;;  %v424_v31 = vsel %vm988_vm2, %v1006_v22, 0.0 }
  0xfb   : > { %v422_v38 = vsel %vm988_vm2, %v1012_v25, 0.0  ;;  %v414_v39 = vsel %vm988_vm2, %v1010_v24, 0.0 }
  0xfd   : > { %429 = vadd.xlane.f32.xlu0 %v413_v26  ;;  %435 = vadd.xlane.f32.xlu1 %v416_v27 }
  0xff   : > { %v1020_v28 = vpop.f32.mrb[4].mxu0  ;;  %v1022_v29 = vpop.f32.mrb[4].mxu1 }
 0x100   : > { %v1030_v32 = vpop.f32.mrb[5].mxu0  ;;  %v1032_v33 = vpop.f32.mrb[5].mxu1  ;;  %v419_v40 = vsel %vm988_vm2, %v1020_v28, 0.0  ;;  %v427_v46 = vsel %vm988_vm2, %v1022_v29, 0.0 }
 0x101   : > { %445 = vadd.xlane.f32.xlu0 %v421_v30  ;;  %451 = vadd.xlane.f32.xlu1 %v424_v31  ;;  %v1034_v34 = vpop.f32.mrb[6].mxu0  ;;  %v1036_v35 = vpop.f32.mrb[6].mxu1  ;;  %v417_v42 = vsel %vm988_vm2, %v1030_v32, 0.0  ;;  %v425_v44 = vsel %vm988_vm2, %v1032_v33, 0.0 }
 0x102   : > { %v1038_v36 = vpop.f32.mrb[7].mxu0  ;;  %v1040_v37 = vpop.f32.mrb[7].mxu1  ;;  %v420_v41 = vsel %vm988_vm2, %v1034_v34, 0.0  ;;  %v428_v47 = vsel %vm988_vm2, %v1036_v35, 0.0 }
 0x103   : > { %v418_v43 = vsel %vm988_vm2, %v1038_v36, 0.0  ;;  %v426_v45 = vsel %vm988_vm2, %v1040_v37, 0.0 }
 0x105   : > { %447 = vadd.xlane.f32.xlu1 %v422_v38  ;;  %431 = vadd.xlane.f32.xlu0 %v414_v39 }
 0x109   : > { %441 = vadd.xlane.f32.xlu0 %v419_v40  ;;  %443 = vadd.xlane.f32.xlu1 %v420_v41 }
 0x10d   : > { %437 = vadd.xlane.f32.xlu0 %v417_v42  ;;  %439 = vadd.xlane.f32.xlu1 %v418_v43 }
 0x111   : > { %453 = vadd.xlane.f32.xlu0 %v425_v44  ;;  %455 = vadd.xlane.f32.xlu1 %v426_v45 }
 0x115   : > { %457 = vadd.xlane.f32.xlu0 %v427_v46  ;;  %459 = vadd.xlane.f32.xlu1 %v428_v47 }
 0x186   : > { %v450_v50 = vpop.xlane.xlu0 %449  ;;  %v434_v51 = vpop.xlane.xlu1 %433 }
 0x187   : > { %v474_v52 = vmul.f32 %v1077_v49, %v450_v50  ;;  %571 = vst.msk [vmem:[%s1082_s9 + $0x50] sm:$0xff] %vm560_vm3, %v450_v50  ;;  %v466_v53 = vmul.f32 %v1077_v49, %v434_v51  ;;  %563 = vst.msk [vmem:[%s1082_s9 + $0x10] sm:$0xff] %vm560_vm3, %v434_v51 }
 0x189   : > { %v482_v54 = vsub.f32 %v992_v16, %v466_v53  ;;  %v490_v55 = vsub.f32 %v994_v17, %v474_v52 }
 0x18a   : > { %v430_v56 = vpop.xlane.xlu0 %429  ;;  %v436_v57 = vpop.xlane.xlu1 %435 }
 0x18b   : > { %v464_v58 = vmul.f32 %v1077_v49, %v430_v56  ;;  %561 = vst.msk [vmem:[%s1082_s9] sm:$0xff] %vm560_vm3, %v430_v56  ;;  %v467_v59 = vmul.f32 %v1077_v49, %v436_v57  ;;  %564 = vst.msk [vmem:[%s1082_s9 + $0x18] sm:$0xff] %vm560_vm3, %v436_v57  ;;  %v498_v60 = vsel %vm988_vm2, %v482_v54, 0.0  ;;  %v506_v62 = vsel %vm988_vm2, %v490_v55, 0.0 }
 0x18c   : > { %v514_v61 = vmul.f32 %v498_v60, %v498_v60  ;;  %v522_v6 = vmul.f32 %v506_v62, %v506_v62 }
 0x18d   : > { %v483_v63 = vsub.f32 %v1008_v23, %v467_v59  ;;  %v480_v0 = vsub.f32 %v996_v18, %v464_v58 }
 0x18e   : > { %v446_v1 = vpop.xlane.xlu0 %445  ;;  %v452_v2 = vpop.xlane.xlu1 %451  ;;  %532 = vadd.xlane.f32.xlu0 %v514_v61 }
 0x18f   : > { %v472_v3 = vmul.f32 %v1077_v49, %v446_v1  ;;  %569 = vst.msk [vmem:[%s1082_s9 + $0x40] sm:$0xff] %vm560_vm3, %v446_v1  ;;  %v475_v4 = vmul.f32 %v1077_v49, %v452_v2  ;;  %572 = vst.msk [vmem:[%s1082_s9 + $0x58] sm:$0xff] %vm560_vm3, %v452_v2  ;;  %v499_v5 = vsel %vm988_vm2, %v483_v63, 0.0  ;;  %v496_v8 = vsel %vm988_vm2, %v480_v0, 0.0 }
 0x190   : > { %v515_v7 = vmul.f32 %v499_v5, %v499_v5  ;;  %v512_v17 = vmul.f32 %v496_v8, %v496_v8 }
 0x191   : > { %v491_v9 = vsub.f32 %v1006_v22, %v475_v4  ;;  %v488_v10 = vsub.f32 %v998_v19, %v472_v3 }
 0x192   : > { %v448_v11 = vpop.xlane.xlu1 %447  ;;  %v432_v12 = vpop.xlane.xlu0 %431  ;;  %548 = vadd.xlane.f32.xlu0 %v522_v6  ;;  %534 = vadd.xlane.f32.xlu1 %v515_v7 }
 0x193   : > { %v473_v13 = vmul.f32 %v1077_v49, %v448_v11  ;;  %570 = vst.msk [vmem:[%s1082_s9 + $0x48] sm:$0xff] %vm560_vm3, %v448_v11  ;;  %v465_v14 = vmul.f32 %v1077_v49, %v432_v12  ;;  %562 = vst.msk [vmem:[%s1082_s9 + $0x8] sm:$0xff] %vm560_vm3, %v432_v12  ;;  %v507_v16 = vsel %vm988_vm2, %v491_v9, 0.0  ;;  %v504_v19 = vsel %vm988_vm2, %v488_v10, 0.0 }
 0x194   : > { %v523_v18 = vmul.f32 %v507_v16, %v507_v16 }
 0x195   : > { %v481_v20 = vsub.f32 %v1010_v24, %v465_v14  ;;  %v489_v21 = vsub.f32 %v1012_v25, %v473_v13  ;;  %v520_v24 = vmul.f32 %v504_v19, %v504_v19 }
 0x196   : > { %v442_v22 = vpop.xlane.xlu0 %441  ;;  %528 = vadd.xlane.f32.xlu0 %v512_v17  ;;  %v444_v23 = vpop.xlane.xlu1 %443  ;;  %550 = vadd.xlane.f32.xlu1 %v523_v18 }
 0x197   : > { %v470_v26 = vmul.f32 %v1077_v49, %v442_v22  ;;  %567 = vst.msk [vmem:[%s1082_s9 + $0x30] sm:$0xff] %vm560_vm3, %v442_v22  ;;  %v471_v27 = vmul.f32 %v1077_v49, %v444_v23  ;;  %568 = vst.msk [vmem:[%s1082_s9 + $0x38] sm:$0xff] %vm560_vm3, %v444_v23  ;;  %v497_v30 = vsel %vm988_vm2, %v481_v20, 0.0  ;;  %v505_v38 = vsel %vm988_vm2, %v489_v21, 0.0 }
 0x198   : > { %v513_v31 = vmul.f32 %v497_v30, %v497_v30  ;;  %v521_v45 = vmul.f32 %v505_v38, %v505_v38 }
 0x199   : > { %v486_v25 = vsub.f32 %v1020_v28, %v470_v26  ;;  %v487_v39 = vsub.f32 %v1034_v34, %v471_v27 }
 0x19a   : > { %544 = vadd.xlane.f32.xlu0 %v520_v24  ;;  %v438_v40 = vpop.xlane.xlu0 %437  ;;  %530 = vadd.xlane.f32.xlu1 %v513_v31  ;;  %v440_v41 = vpop.xlane.xlu1 %439 }
 0x19b   : > { %v468_v42 = vmul.f32 %v1077_v49, %v438_v40  ;;  %565 = vst.msk [vmem:[%s1082_s9 + $0x20] sm:$0xff] %vm560_vm3, %v438_v40  ;;  %v469_v43 = vmul.f32 %v1077_v49, %v440_v41  ;;  %566 = vst.msk [vmem:[%s1082_s9 + $0x28] sm:$0xff] %vm560_vm3, %v440_v41  ;;  %v502_v28 = vsel %vm988_vm2, %v486_v25, 0.0  ;;  %v503_v46 = vsel %vm988_vm2, %v487_v39, 0.0 }
 0x19c   : > { %v518_v44 = vmul.f32 %v502_v28, %v502_v28  ;;  %v519_v54 = vmul.f32 %v503_v46, %v503_v46 }
 0x19d   : > { %v484_v34 = vsub.f32 %v1030_v32, %v468_v42  ;;  %v485_v47 = vsub.f32 %v1038_v36, %v469_v43 }
 0x19e   : > { %540 = vadd.xlane.f32.xlu0 %v518_v44  ;;  %v454_v48 = vpop.xlane.xlu0 %453  ;;  %546 = vadd.xlane.f32.xlu1 %v521_v45  ;;  %v456_v50 = vpop.xlane.xlu1 %455 }
 0x19f   : > { %v476_v51 = vmul.f32 %v1077_v49, %v454_v48  ;;  %573 = vst.msk [vmem:[%s1082_s9 + $0x60] sm:$0xff] %vm560_vm3, %v454_v48  ;;  %v477_v52 = vmul.f32 %v1077_v49, %v456_v50  ;;  %574 = vst.msk [vmem:[%s1082_s9 + $0x68] sm:$0xff] %vm560_vm3, %v456_v50  ;;  %v500_v32 = vsel %vm988_vm2, %v484_v34, 0.0  ;;  %v501_v55 = vsel %vm988_vm2, %v485_v47, 0.0 }
 0x1a0   : > { %v516_v53 = vmul.f32 %v500_v32, %v500_v32  ;;  %v517_v62 = vmul.f32 %v501_v55, %v501_v55 }
 0x1a1   : > { %v492_v36 = vsub.f32 %v1032_v33, %v476_v51  ;;  %v493_v56 = vsub.f32 %v1040_v37, %v477_v52 }
 0x1a2   : > { %536 = vadd.xlane.f32.xlu0 %v516_v53  ;;  %v458_v57 = vpop.xlane.xlu0 %457  ;;  %542 = vadd.xlane.f32.xlu1 %v519_v54  ;;  %v460_v58 = vpop.xlane.xlu1 %459 }
 0x1a3   : > { %v478_v59 = vmul.f32 %v1077_v49, %v458_v57  ;;  %575 = vst.msk [vmem:[%s1082_s9 + $0x70] sm:$0xff] %vm560_vm3, %v458_v57  ;;  %v479_v60 = vmul.f32 %v1077_v49, %v460_v58  ;;  %576 = vst.msk [vmem:[%s1082_s9 + $0x78] sm:$0xff] %vm560_vm3, %v460_v58  ;;  %v508_v33 = vsel %vm988_vm2, %v492_v36, 0.0  ;;  %v509_v63 = vsel %vm988_vm2, %v493_v56, 0.0 }
 0x1a4   : > { %v524_v61 = vmul.f32 %v508_v33, %v508_v33  ;;  %v525_v2 = vmul.f32 %v509_v63, %v509_v63 }
 0x1a5   : > { %v494_v37 = vsub.f32 %v1022_v29, %v478_v59  ;;  %v495_v0 = vsub.f32 %v1036_v35, %v479_v60 }
 0x1a6   : > { %552 = vadd.xlane.f32.xlu0 %v524_v61  ;;  %538 = vadd.xlane.f32.xlu1 %v517_v62 }
 0x1a7   : > { %v510_v49 = vsel %vm988_vm2, %v494_v37, 0.0  ;;  %v511_v3 = vsel %vm988_vm2, %v495_v0, 0.0 }
 0x1a8   : > { %v526_v1 = vmul.f32 %v510_v49, %v510_v49  ;;  %v527_v29 = vmul.f32 %v511_v3, %v511_v3 }
 0x1aa   : > { %556 = vadd.xlane.f32.xlu0 %v526_v1  ;;  %554 = vadd.xlane.f32.xlu1 %v525_v2 }
 0x1ae   : > { %558 = vadd.xlane.f32.xlu1 %v527_v29 }
 0x21b   : > { %v533_v35 = vpop.xlane.xlu0 %532 }
 0x21c   : > { %580 = vst.msk [vmem:[%s1082_s9 + $0x10] sm:$0xff] %vm577_vm4, %v533_v35 }
 0x21f   : > { %v549_v4 = vpop.xlane.xlu0 %548  ;;  %v535_v5 = vpop.xlane.xlu1 %534 }
 0x220   : > { %588 = vst.msk [vmem:[%s1082_s9 + $0x50] sm:$0xff] %vm577_vm4, %v549_v4  ;;  %581 = vst.msk [vmem:[%s1082_s9 + $0x18] sm:$0xff] %vm577_vm4, %v535_v5 }
 0x223   : > { %v529_v15 = vpop.xlane.xlu0 %528  ;;  %v551_v6 = vpop.xlane.xlu1 %550 }
 0x224   : > { %578 = vst.msk [vmem:[%s1082_s9] sm:$0xff] %vm577_vm4, %v529_v15  ;;  %589 = vst.msk [vmem:[%s1082_s9 + $0x58] sm:$0xff] %vm577_vm4, %v551_v6 }
 0x227   : > { %v545_v7 = vpop.xlane.xlu0 %544  ;;  %v531_v8 = vpop.xlane.xlu1 %530 }
 0x228   : > { %586 = vst.msk [vmem:[%s1082_s9 + $0x40] sm:$0xff] %vm577_vm4, %v545_v7  ;;  %579 = vst.msk [vmem:[%s1082_s9 + $0x8] sm:$0xff] %vm577_vm4, %v531_v8 }
 0x22b   : > { %v541_v9 = vpop.xlane.xlu0 %540  ;;  %v547_v10 = vpop.xlane.xlu1 %546 }
 0x22c   : > { %584 = vst.msk [vmem:[%s1082_s9 + $0x30] sm:$0xff] %vm577_vm4, %v541_v9  ;;  %587 = vst.msk [vmem:[%s1082_s9 + $0x48] sm:$0xff] %vm577_vm4, %v547_v10 }
 0x22f   : > { %v537_v11 = vpop.xlane.xlu0 %536  ;;  %v543_v12 = vpop.xlane.xlu1 %542 }
 0x230   : > { %582 = vst.msk [vmem:[%s1082_s9 + $0x20] sm:$0xff] %vm577_vm4, %v537_v11  ;;  %585 = vst.msk [vmem:[%s1082_s9 + $0x38] sm:$0xff] %vm577_vm4, %v543_v12 }
 0x233   : > { %v553_v13 = vpop.xlane.xlu0 %552  ;;  %v539_v14 = vpop.xlane.xlu1 %538 }
 0x234   : > { %590 = vst.msk [vmem:[%s1082_s9 + $0x60] sm:$0xff] %vm577_vm4, %v553_v13  ;;  %583 = vst.msk [vmem:[%s1082_s9 + $0x28] sm:$0xff] %vm577_vm4, %v539_v14 }
 0x237   : > { %v557_v16 = vpop.xlane.xlu0 %556  ;;  %v555_v17 = vpop.xlane.xlu1 %554 }
 0x238   : > { %592 = vst.msk [vmem:[%s1082_s9 + $0x70] sm:$0xff] %vm577_vm4, %v557_v16  ;;  %591 = vst.msk [vmem:[%s1082_s9 + $0x68] sm:$0xff] %vm577_vm4, %v555_v17 }
 0x23b   : > { %v559_v18 = vpop.xlane.xlu1 %558 }
 0x23c   : > { %593 = vst.msk [vmem:[%s1082_s9 + $0x78] sm:$0xff] %vm577_vm4, %v559_v18 }
 0x23d PF: > { %s12_s15 = sadd.s32 1, %s872_s15   ;;  %s1238_s9 = smov %s852_s10 }
 0x23e   : > { %p9_p13 = scmp.ge.s32.totalorder %s12_s15, 6   ;;  %s1239_s10 = smov %s940_s22 }
 0x23f   : > { %s1240_s11 = smov %s864_s13  ;;  %s1241_s12 = smov %s868_s14 }
 0x240   : > { %s1242_s13 = smov %s1245_s16  ;;  %s1243_s14 = smov %s1249_s17 }
 0x241   :  { %11 = sbr.rel (!%p9_p13) target bundleno = 4 (0x4), region = 104 }

</bundles_post_ra>
